<compile_context>
chip_gen: v7x
topology: tpu7x:2x2x1
jax: 0.10.0
libtpu: 0.0.40
codegen_flags: <defaults>
</compile_context>

<pallas_src>
import functools

import jax
import jax.numpy as jnp
from jax.experimental import pallas as pl
from jax.experimental.pallas import tpu as pltpu

_NEG = -1e30  # "minus infinity" for padded lane columns (finite -> no inf-inf NaNs)


# --------------------------------------------------------------------------- #
# Kernel
# --------------------------------------------------------------------------- #
def _radar_cnn1_kernel(x_ref, w_ref, b_ref, o_ref, *, stride, n_steps):
    """One grid step: an (8, C) lane-dense tile of packed batch rows.

    x_ref: (1, 8, C) input tile   (each aligned `stride`-lane group = one batch row)
    w_ref: (7, C)    per-position 7-tap effective conv stencil (grid-invariant)
    b_ref: (1, C)    per-position effective bias               (grid-invariant)
    o_ref: (1, 8, C) output tile (softmax over every batch row)
    """
    x = x_ref[0]                                     # (8, C)
    C = x.shape[-1]

    # ---- collapsed conv1->conv2->conv3: position-dependent 7-tap affine map ----
    # Taps whose source position lies outside the batch row have exactly-zero
    # weights, so the circular wrap of `roll` (reading a neighbouring row) can
    # never contaminate the result -> no masks needed here.
    logits = b_ref[...] + w_ref[3:4, :] * x          # centre tap + bias
    for d in (1, 2, 3):
        xp = pltpu.roll(x, shift=C - d, axis=1)      # lane n <- lane n+d (per sublane row)
        xm = pltpu.roll(x, shift=d, axis=1)          # lane n <- lane n-d
        logits = logits + w_ref[3 + d:4 + d, :] * xp + w_ref[3 - d:4 - d, :] * xm

    # ---- softmax over every batch row (= every aligned group of `stride` lanes) ---
    # XOR-butterfly segmented all-reduce: after log2(stride) steps every lane holds
    # the reduction over its whole row.  Rolls -> XLU; selects/adds -> VPU.
    pos = jax.lax.broadcasted_iota(jnp.int32, x.shape, 1) & (stride - 1)
    masks = [(pos & (1 << k)) == 0 for k in range(n_steps)]

    def seg_allreduce(v, combine):
        for k in range(n_steps):
            s = 1 << k
            fwd = pltpu.roll(v, shift=C - s, axis=1)   # partner lane n+s
            bwd = pltpu.roll(v, shift=s, axis=1)       # partner lane n-s
            v = combine(v, jnp.where(masks[k], fwd, bwd))
        return v

    m = seg_allreduce(logits, jnp.maximum)             # per-row max (numerically safe)
    e = jnp.exp(logits - m)
    s_sum = seg_allreduce(e, jnp.add)                  # per-row sum
    inv = pl.reciprocal(s_sum, approx=True)            # EUP slot
    inv = inv * (2.0 - s_sum * inv)                    # one Newton step (~1e-7 rel err)
    o_ref[0] = (e * inv).astype(o_ref.dtype)


# --------------------------------------------------------------------------- #
# Wrapper
# --------------------------------------------------------------------------- #
def _conv1d_ref(x, w, b):
    # x: (B, Cin, L), w: (Cout, Cin, 3), b: (Cout,)  -- PyTorch Conv1d, padding=1
    y = jax.lax.conv_general_dilated(
        x, w, window_strides=(1,), padding=((1, 1),),
        dimension_numbers=("NCH", "OIH", "NCH"),
        precision=jax.lax.Precision.HIGHEST)
    return y + b[None, :, None]


def _effective_affine(L, params):
    """Collapse the activation-free conv stack into y = A x + c for one row and
    return it as a position-dependent 7-tap stencil (7, L) plus bias (L,)."""
    f32 = jnp.float32
    w1, b1, w2, b2, w3, b3 = [p.astype(f32) for p in params]

    def row_fn(row):                               # (L,) -> (L,)
        h = row[None, None, :]
        h = _conv1d_ref(h, w1, b1)
        h = _conv1d_ref(h, w2, b2)
        h = _conv1d_ref(h, w3, b3)
        return h[0, 0, :]

    zero = jnp.zeros((L,), f32)
    A = jax.jacfwd(row_fn)(zero)                   # (L, L): A[l, m] = d y[l] / d x[m]
    c = row_fn(zero)                               # (L,) effective bias

    taps = []
    for d in range(-3, 4):                         # receptive field of 3 stacked k=3 convs
        col = jnp.zeros((L,), f32)
        lo, hi = max(0, -d), min(L, L - d)
        if hi > lo:
            idx = jnp.arange(lo, hi)
            col = col.at[idx].set(A[idx, idx + d])
        taps.append(col)
    return jnp.stack(taps, axis=0), c              # (7, L), (L,)


def radar_cnn1_forward(x, params, *, rows_per_block=None):
    """x: (B, 1, L) float ; params: (w1, b1, w2, b2, w3, b3) in PyTorch Conv1d layout."""
    f32 = jnp.float32
    B, c_in, L = x.shape
    assert c_in == 1
    L = int(L)

    # Lane stride per batch row: next power of two (butterfly reduce needs pow2).
    stride = 1 << max(L - 1, 0).bit_length()
    n_steps = stride.bit_length() - 1              # log2(stride)

    # ---- tile sizing ---------------------------------------------------------
    # (8, C) tile per grid step: 8 sublanes x C lanes, C = rows_per_sublane*stride,
    # C a multiple of 128 (unmasked stores, fully packed vregs).
    g = max(1, 128 // stride)                      # batch rows per 128-lane granule
    row_granule = 8 * g                            # TB granularity (8 sublanes)
    MAX_LANES = 64 * 1024                          # ~512 KiB HBM/step, ~4 MiB VMEM total
    tb_cap = max(row_granule, (MAX_LANES // stride) // row_granule * row_granule)
    if rows_per_block is None:
        # Biggest tile under the budget, but keep >= 2 grid steps when the batch
        # allows it so both v7x TensorCores get work on the "parallel" grid axis
        # (the extra ~0.35 us step is noise on single-core v5e/v6e).
        tb = max(row_granule, -(-B // 2))
    else:
        tb = max(int(rows_per_block), 1)
    tb = -(-tb // row_granule) * row_granule       # round up to granule
    TB = min(tb, tb_cap)

    G = pl.cdiv(B, TB)
    B_pad = G * TB
    C = (TB // 8) * stride                         # lanes per sublane row (mult. of 128)

    # ---- data / constant prep ------------------------------------------------
    x2 = x.reshape(B, L).astype(f32)
    if stride != L:
        x2 = jnp.pad(x2, ((0, 0), (0, stride - L)))
    if B_pad != B:
        x2 = jnp.pad(x2, ((0, B_pad - B), (0, 0)))
    xr = x2.reshape(G, 8, C)                       # row-major packing of batch rows

    w7, bias = _effective_affine(L, params)        # (7, L), (L,)
    if stride != L:
        w7 = jnp.pad(w7, ((0, 0), (0, stride - L)))
        bias = jnp.concatenate([bias, jnp.full((stride - L,), _NEG, f32)])
    reps = C // stride
    w7_c = jnp.tile(w7, (1, reps))                 # (7, C)  grid-invariant
    bias_c = jnp.tile(bias, (reps,))[None, :]      # (1, C)  grid-invariant

    kernel = functools.partial(_radar_cnn1_kernel, stride=stride, n_steps=n_steps)

    def build_and_run(single_buffer_consts):
        const_kw = dict(pipeline_mode=pl.Buffered(1)) if single_buffer_consts else {}
        in_specs = [
            pl.BlockSpec((1, 8, C), lambda i: (i, 0, 0)),          # batch tile
            pl.BlockSpec((7, C), lambda i: (0, 0), **const_kw),    # 7-tap stencil
            pl.BlockSpec((1, C), lambda i: (0, 0), **const_kw),    # bias
        ]
        return pl.pallas_call(
            kernel,
            out_shape=jax.ShapeDtypeStruct((G, 8, C), f32),
            grid=(G,),
            in_specs=in_specs,
            out_specs=pl.BlockSpec((1, 8, C), lambda i: (i, 0, 0)),
            compiler_params=pltpu.CompilerParams(
                dimension_semantics=("parallel",),
                vmem_limit_bytes=32 * 1024 * 1024,
            ),
        )(xr, w7_c, bias_c)

    try:
        out = build_and_run(True)    # constants single-buffered (halves their VMEM)
    except Exception:                # fallback if BlockSpec lacks pipeline_mode
        out = build_and_run(False)

    return out.reshape(B_pad, stride)[:B, :L]


# ---------------- reference (pure JAX) for validation ----------------
def radar_cnn1_ref(x, params):
    w1, b1, w2, b2, w3, b3 = params
    h = _conv1d_ref(x, w1, b1)
    h = _conv1d_ref(h, w2, b2)
    h = _conv1d_ref(h, w3, b3)
    h = h.reshape(h.shape[0], -1)
    return jax.nn.softmax(h, axis=1)


def init_params(key):
    def conv_init(k, c_out, c_in, ksz=3):
        kw, kb = jax.random.split(k)
        bound = 1.0 / jnp.sqrt(c_in * ksz)          # PyTorch default Conv1d init range
        w = jax.random.uniform(kw, (c_out, c_in, ksz), jnp.float32, -bound, bound)
        b = jax.random.uniform(kb, (c_out,), jnp.float32, -bound, bound)
        return w, b

    k1, k2, k3 = jax.random.split(key, 3)
    w1, b1 = conv_init(k1, 8, 1)
    w2, b2 = conv_init(k2, 16, 8)
    w3, b3 = conv_init(k3, 1, 16)
    return (w1, b1, w2, b2, w3, b3)


if __name__ == "__main__":
    key = jax.random.PRNGKey(0)
    k_x, k_p, k_x2 = jax.random.split(key, 3)
    params = init_params(k_p)

    # Small shape implied by the module: (batch=2, channels=1, length=16).
    B, L = 2, 16
    x = jax.random.normal(k_x, (B, 1, L), dtype=jnp.float32)
    out = jax.block_until_ready(radar_cnn1_forward(x, params))
    ref = radar_cnn1_ref(x, params)
    assert out.shape == (B, L)
    assert jnp.allclose(out, ref, atol=1e-5, rtol=1e-3), "mismatch vs JAX reference"
    assert jnp.allclose(jnp.sum(out, axis=1), 1.0, atol=1e-5)

    # Second config: exercises multiple grid steps and zero-padded tail rows.
    B2 = 100
    x2 = jax.random.normal(k_x2, (B2, 1, L), dtype=jnp.float32)
    out2 = jax.block_until_ready(radar_cnn1_forward(x2, params))
    ref2 = radar_cnn1_ref(x2, params)
    assert out2.shape == (B2, L)
    assert jnp.allclose(out2, ref2, atol=1e-5, rtol=1e-3), "mismatch vs ref (B=100)"

    print("KERNEL_OK")
</pallas_src>

<mosaic_0001>
module attributes {stable_mosaic.version = 11 : i64} {
  func.func @_radar_cnn1_kernel(%arg0: i32, %arg1: memref<1x8x128xf32, #tpu.memory_space<vmem>>, %arg2: memref<7x128xf32, #tpu.memory_space<vmem>>, %arg3: memref<1x128xf32, #tpu.memory_space<vmem>>, %arg4: memref<1x8x128xf32, #tpu.memory_space<vmem>>) attributes {dimension_semantics = [#tpu.dimension_semantics<parallel>], iteration_bounds = array<i64: 1>, scalar_prefetch = 0 : i64, scratch_operands = 0 : i64, tpu.core_type = #tpu.core_type<tc>, window_params = [{transform_indices = @transform_0, window_bounds = array<i64: 1, 8, 128>}, {pipeline_mode = #tpu.pipeline_mode<synchronous>, transform_indices = @transform_1, window_bounds = array<i64: 7, 128>}, {pipeline_mode = #tpu.pipeline_mode<synchronous>, transform_indices = @transform_2, window_bounds = array<i64: 1, 128>}, {transform_indices = @transform_3, window_bounds = array<i64: 1, 8, 128>}]} {
    %c0 = arith.constant 0 : index
    %c0_0 = arith.constant 0 : index
    %c0_1 = arith.constant 0 : index
    %0 = vector.load %arg1[%c0, %c0_0, %c0_1] : memref<1x8x128xf32, #tpu.memory_space<vmem>>, vector<1x8x128xf32>
    %1 = vector.shape_cast %0 : vector<1x8x128xf32> to vector<8x128xf32>
    %c0_2 = arith.constant 0 : index
    %c0_3 = arith.constant 0 : index
    %2 = vector.load %arg3[%c0_2, %c0_3] : memref<1x128xf32, #tpu.memory_space<vmem>>, vector<1x128xf32>
    %c3 = arith.constant 3 : index
    %c0_4 = arith.constant 0 : index
    %3 = vector.load %arg2[%c3, %c0_4] : memref<7x128xf32, #tpu.memory_space<vmem>>, vector<1x128xf32>
    %4 = vector.broadcast %3 : vector<1x128xf32> to vector<8x128xf32>
    %5 = arith.mulf %4, %1 : vector<8x128xf32>
    %6 = vector.broadcast %2 : vector<1x128xf32> to vector<8x128xf32>
    %7 = arith.addf %6, %5 : vector<8x128xf32>
    %c127_i32 = arith.constant 127 : i32
    %8 = tpu.dynamic_rotate %1 by %c127_i32 dim 1 : vector<8x128xf32>, i32 -> vector<8x128xf32>
    %c1_i32 = arith.constant 1 : i32
    %9 = tpu.dynamic_rotate %1 by %c1_i32 dim 1 : vector<8x128xf32>, i32 -> vector<8x128xf32>
    %c4 = arith.constant 4 : index
    %c0_5 = arith.constant 0 : index
    %10 = vector.load %arg2[%c4, %c0_5] : memref<7x128xf32, #tpu.memory_space<vmem>>, vector<1x128xf32>
    %11 = vector.broadcast %10 : vector<1x128xf32> to vector<8x128xf32>
    %12 = arith.mulf %11, %8 : vector<8x128xf32>
    %13 = arith.addf %7, %12 : vector<8x128xf32>
    %c2 = arith.constant 2 : index
    %c0_6 = arith.constant 0 : index
    %14 = vector.load %arg2[%c2, %c0_6] : memref<7x128xf32, #tpu.memory_space<vmem>>, vector<1x128xf32>
    %15 = vector.broadcast %14 : vector<1x128xf32> to vector<8x128xf32>
    %16 = arith.mulf %15, %9 : vector<8x128xf32>
    %17 = arith.addf %13, %16 : vector<8x128xf32>
    %c126_i32 = arith.constant 126 : i32
    %18 = tpu.dynamic_rotate %1 by %c126_i32 dim 1 : vector<8x128xf32>, i32 -> vector<8x128xf32>
    %c2_i32 = arith.constant 2 : i32
    %19 = tpu.dynamic_rotate %1 by %c2_i32 dim 1 : vector<8x128xf32>, i32 -> vector<8x128xf32>
    %c5 = arith.constant 5 : index
    %c0_7 = arith.constant 0 : index
    %20 = vector.load %arg2[%c5, %c0_7] : memref<7x128xf32, #tpu.memory_space<vmem>>, vector<1x128xf32>
    %21 = vector.broadcast %20 : vector<1x128xf32> to vector<8x128xf32>
    %22 = arith.mulf %21, %18 : vector<8x128xf32>
    %23 = arith.addf %17, %22 : vector<8x128xf32>
    %c1 = arith.constant 1 : index
    %c0_8 = arith.constant 0 : index
    %24 = vector.load %arg2[%c1, %c0_8] : memref<7x128xf32, #tpu.memory_space<vmem>>, vector<1x128xf32>
    %25 = vector.broadcast %24 : vector<1x128xf32> to vector<8x128xf32>
    %26 = arith.mulf %25, %19 : vector<8x128xf32>
    %27 = arith.addf %23, %26 : vector<8x128xf32>
    %c125_i32 = arith.constant 125 : i32
    %28 = tpu.dynamic_rotate %1 by %c125_i32 dim 1 : vector<8x128xf32>, i32 -> vector<8x128xf32>
    %c3_i32 = arith.constant 3 : i32
    %29 = tpu.dynamic_rotate %1 by %c3_i32 dim 1 : vector<8x128xf32>, i32 -> vector<8x128xf32>
    %c6 = arith.constant 6 : index
    %c0_9 = arith.constant 0 : index
    %30 = vector.load %arg2[%c6, %c0_9] : memref<7x128xf32, #tpu.memory_space<vmem>>, vector<1x128xf32>
    %31 = vector.broadcast %30 : vector<1x128xf32> to vector<8x128xf32>
    %32 = arith.mulf %31, %28 : vector<8x128xf32>
    %33 = arith.addf %27, %32 : vector<8x128xf32>
    %c0_10 = arith.constant 0 : index
    %c0_11 = arith.constant 0 : index
    %34 = vector.load %arg2[%c0_10, %c0_11] : memref<7x128xf32, #tpu.memory_space<vmem>>, vector<1x128xf32>
    %35 = vector.broadcast %34 : vector<1x128xf32> to vector<8x128xf32>
    %36 = arith.mulf %35, %29 : vector<8x128xf32>
    %37 = arith.addf %33, %36 : vector<8x128xf32>
    %38 = tpu.iota {dimensions = array<i32: 1>} : vector<8x128xi32>
    %c15_i32 = arith.constant 15 : i32
    %39 = vector.broadcast %c15_i32 : i32 to vector<8x128xi32>
    %40 = arith.andi %38, %39 : vector<8x128xi32>
    %c1_i32_12 = arith.constant 1 : i32
    %41 = vector.broadcast %c1_i32_12 : i32 to vector<8x128xi32>
    %42 = arith.andi %40, %41 : vector<8x128xi32>
    %c0_i32 = arith.constant 0 : i32
    %43 = vector.broadcast %c0_i32 : i32 to vector<8x128xi32>
    %44 = arith.cmpi eq, %42, %43 : vector<8x128xi32>
    %c2_i32_13 = arith.constant 2 : i32
    %45 = vector.broadcast %c2_i32_13 : i32 to vector<8x128xi32>
    %46 = arith.andi %40, %45 : vector<8x128xi32>
    %c0_i32_14 = arith.constant 0 : i32
    %47 = vector.broadcast %c0_i32_14 : i32 to vector<8x128xi32>
    %48 = arith.cmpi eq, %46, %47 : vector<8x128xi32>
    %c4_i32 = arith.constant 4 : i32
    %49 = vector.broadcast %c4_i32 : i32 to vector<8x128xi32>
    %50 = arith.andi %40, %49 : vector<8x128xi32>
    %c0_i32_15 = arith.constant 0 : i32
    %51 = vector.broadcast %c0_i32_15 : i32 to vector<8x128xi32>
    %52 = arith.cmpi eq, %50, %51 : vector<8x128xi32>
    %c8_i32 = arith.constant 8 : i32
    %53 = vector.broadcast %c8_i32 : i32 to vector<8x128xi32>
    %54 = arith.andi %40, %53 : vector<8x128xi32>
    %c0_i32_16 = arith.constant 0 : i32
    %55 = vector.broadcast %c0_i32_16 : i32 to vector<8x128xi32>
    %56 = arith.cmpi eq, %54, %55 : vector<8x128xi32>
    %c127_i32_17 = arith.constant 127 : i32
    %57 = tpu.dynamic_rotate %37 by %c127_i32_17 dim 1 : vector<8x128xf32>, i32 -> vector<8x128xf32>
    %c1_i32_18 = arith.constant 1 : i32
    %58 = tpu.dynamic_rotate %37 by %c1_i32_18 dim 1 : vector<8x128xf32>, i32 -> vector<8x128xf32>
    %59 = arith.select %44, %57, %58 : vector<8x128xi1>, vector<8x128xf32>
    %60 = arith.maximumf %37, %59 : vector<8x128xf32>
    %c126_i32_19 = arith.constant 126 : i32
    %61 = tpu.dynamic_rotate %60 by %c126_i32_19 dim 1 : vector<8x128xf32>, i32 -> vector<8x128xf32>
    %c2_i32_20 = arith.constant 2 : i32
    %62 = tpu.dynamic_rotate %60 by %c2_i32_20 dim 1 : vector<8x128xf32>, i32 -> vector<8x128xf32>
    %63 = arith.select %48, %61, %62 : vector<8x128xi1>, vector<8x128xf32>
    %64 = arith.maximumf %60, %63 : vector<8x128xf32>
    %c124_i32 = arith.constant 124 : i32
    %65 = tpu.dynamic_rotate %64 by %c124_i32 dim 1 : vector<8x128xf32>, i32 -> vector<8x128xf32>
    %c4_i32_21 = arith.constant 4 : i32
    %66 = tpu.dynamic_rotate %64 by %c4_i32_21 dim 1 : vector<8x128xf32>, i32 -> vector<8x128xf32>
    %67 = arith.select %52, %65, %66 : vector<8x128xi1>, vector<8x128xf32>
    %68 = arith.maximumf %64, %67 : vector<8x128xf32>
    %c120_i32 = arith.constant 120 : i32
    %69 = tpu.dynamic_rotate %68 by %c120_i32 dim 1 : vector<8x128xf32>, i32 -> vector<8x128xf32>
    %c8_i32_22 = arith.constant 8 : i32
    %70 = tpu.dynamic_rotate %68 by %c8_i32_22 dim 1 : vector<8x128xf32>, i32 -> vector<8x128xf32>
    %71 = arith.select %56, %69, %70 : vector<8x128xi1>, vector<8x128xf32>
    %72 = arith.maximumf %68, %71 : vector<8x128xf32>
    %73 = arith.subf %37, %72 : vector<8x128xf32>
    %74 = math.exp %73 : vector<8x128xf32>
    %c127_i32_23 = arith.constant 127 : i32
    %75 = tpu.dynamic_rotate %74 by %c127_i32_23 dim 1 : vector<8x128xf32>, i32 -> vector<8x128xf32>
    %c1_i32_24 = arith.constant 1 : i32
    %76 = tpu.dynamic_rotate %74 by %c1_i32_24 dim 1 : vector<8x128xf32>, i32 -> vector<8x128xf32>
    %77 = arith.select %44, %75, %76 : vector<8x128xi1>, vector<8x128xf32>
    %78 = arith.addf %74, %77 : vector<8x128xf32>
    %c126_i32_25 = arith.constant 126 : i32
    %79 = tpu.dynamic_rotate %78 by %c126_i32_25 dim 1 : vector<8x128xf32>, i32 -> vector<8x128xf32>
    %c2_i32_26 = arith.constant 2 : i32
    %80 = tpu.dynamic_rotate %78 by %c2_i32_26 dim 1 : vector<8x128xf32>, i32 -> vector<8x128xf32>
    %81 = arith.select %48, %79, %80 : vector<8x128xi1>, vector<8x128xf32>
    %82 = arith.addf %78, %81 : vector<8x128xf32>
    %c124_i32_27 = arith.constant 124 : i32
    %83 = tpu.dynamic_rotate %82 by %c124_i32_27 dim 1 : vector<8x128xf32>, i32 -> vector<8x128xf32>
    %c4_i32_28 = arith.constant 4 : i32
    %84 = tpu.dynamic_rotate %82 by %c4_i32_28 dim 1 : vector<8x128xf32>, i32 -> vector<8x128xf32>
    %85 = arith.select %52, %83, %84 : vector<8x128xi1>, vector<8x128xf32>
    %86 = arith.addf %82, %85 : vector<8x128xf32>
    %c120_i32_29 = arith.constant 120 : i32
    %87 = tpu.dynamic_rotate %86 by %c120_i32_29 dim 1 : vector<8x128xf32>, i32 -> vector<8x128xf32>
    %c8_i32_30 = arith.constant 8 : i32
    %88 = tpu.dynamic_rotate %86 by %c8_i32_30 dim 1 : vector<8x128xf32>, i32 -> vector<8x128xf32>
    %89 = arith.select %56, %87, %88 : vector<8x128xi1>, vector<8x128xf32>
    %90 = arith.addf %86, %89 : vector<8x128xf32>
    %91 = tpu.reciprocal %90 {approx = true} : vector<8x128xf32> -> vector<8x128xf32>
    %92 = arith.mulf %90, %91 : vector<8x128xf32>
    %cst = arith.constant 2.000000e+00 : f32
    %93 = vector.broadcast %cst : f32 to vector<8x128xf32>
    %94 = arith.subf %93, %92 : vector<8x128xf32>
    %95 = arith.mulf %91, %94 : vector<8x128xf32>
    %96 = arith.mulf %74, %95 : vector<8x128xf32>
    %c0_31 = arith.constant 0 : index
    %c0_32 = arith.constant 0 : index
    %c0_33 = arith.constant 0 : index
    %97 = vector.load %arg4[%c0_31, %c0_32, %c0_33] : memref<1x8x128xf32, #tpu.memory_space<vmem>>, vector<1x8x128xf32>
    %98 = vector.shape_cast %97 : vector<1x8x128xf32> to vector<8x128xf32>
    %99 = vector.shape_cast %96 : vector<8x128xf32> to vector<1x8x128xf32>
    tpu.vector_store %arg4[%c0_31, %c0_32, %c0_33], %99 {strides = array<i32>} : memref<1x8x128xf32, #tpu.memory_space<vmem>>, vector<1x8x128xf32>,
    return
  }
  func.func @transform_0(%arg0: i32) -> (i32, i32, i32) {
    %c0_i32 = arith.constant 0 : i32
    %c0_i32_0 = arith.constant 0 : i32
    %c0_i32_1 = arith.constant 0 : i32
    return %arg0, %c0_i32, %c0_i32_0 : i32, i32, i32
  }
  func.func @transform_1(%arg0: i32) -> (i32, i32) {
    %c0_i32 = arith.constant 0 : i32
    %c0_i32_0 = arith.constant 0 : i32
    %c0_i32_1 = arith.constant 0 : i32
    return %c0_i32, %c0_i32_0 : i32, i32
  }
  func.func @transform_2(%arg0: i32) -> (i32, i32) {
    %c0_i32 = arith.constant 0 : i32
    %c0_i32_0 = arith.constant 0 : i32
    %c0_i32_1 = arith.constant 0 : i32
    return %c0_i32, %c0_i32_0 : i32, i32
  }
  func.func @transform_3(%arg0: i32) -> (i32, i32, i32) {
    %c0_i32 = arith.constant 0 : i32
    %c0_i32_0 = arith.constant 0 : i32
    %c0_i32_1 = arith.constant 0 : i32
    return %arg0, %c0_i32, %c0_i32_0 : i32, i32, i32
  }
}

module attributes {stable_mosaic.version = 11 : i64} {
  func.func @_radar_cnn1_kernel(%arg0: i32, %arg1: memref<1x8x128xf32, #tpu.memory_space<vmem>>, %arg2: memref<7x128xf32, #tpu.memory_space<vmem>>, %arg3: memref<1x128xf32, #tpu.memory_space<vmem>>, %arg4: memref<1x8x128xf32, #tpu.memory_space<vmem>>) attributes {dimension_semantics = [#tpu.dimension_semantics<parallel>], iteration_bounds = array<i64: 1>, scalar_prefetch = 0 : i64, scratch_operands = 0 : i64, tpu.core_type = #tpu.core_type<tc>, window_params = [{transform_indices = @transform_0, window_bounds = array<i64: 1, 8, 128>}, {pipeline_mode = #tpu.pipeline_mode<synchronous>, transform_indices = @transform_1, window_bounds = array<i64: 7, 128>}, {pipeline_mode = #tpu.pipeline_mode<synchronous>, transform_indices = @transform_2, window_bounds = array<i64: 1, 128>}, {transform_indices = @transform_3, window_bounds = array<i64: 1, 8, 128>}]} {
    %c0 = arith.constant 0 : index
    %c0_0 = arith.constant 0 : index
    %c0_1 = arith.constant 0 : index
    %0 = vector.load %arg1[%c0, %c0_0, %c0_1] : memref<1x8x128xf32, #tpu.memory_space<vmem>>, vector<1x8x128xf32>
    %1 = vector.shape_cast %0 : vector<1x8x128xf32> to vector<8x128xf32>
    %c0_2 = arith.constant 0 : index
    %c0_3 = arith.constant 0 : index
    %2 = vector.load %arg3[%c0_2, %c0_3] : memref<1x128xf32, #tpu.memory_space<vmem>>, vector<1x128xf32>
    %c3 = arith.constant 3 : index
    %c0_4 = arith.constant 0 : index
    %3 = vector.load %arg2[%c3, %c0_4] : memref<7x128xf32, #tpu.memory_space<vmem>>, vector<1x128xf32>
    %4 = vector.broadcast %3 : vector<1x128xf32> to vector<8x128xf32>
    %5 = arith.mulf %4, %1 : vector<8x128xf32>
    %6 = vector.broadcast %2 : vector<1x128xf32> to vector<8x128xf32>
    %7 = arith.addf %6, %5 : vector<8x128xf32>
    %c127_i32 = arith.constant 127 : i32
    %8 = tpu.dynamic_rotate %1 by %c127_i32 dim 1 : vector<8x128xf32>, i32 -> vector<8x128xf32>
    %c1_i32 = arith.constant 1 : i32
    %9 = tpu.dynamic_rotate %1 by %c1_i32 dim 1 : vector<8x128xf32>, i32 -> vector<8x128xf32>
    %c4 = arith.constant 4 : index
    %c0_5 = arith.constant 0 : index
    %10 = vector.load %arg2[%c4, %c0_5] : memref<7x128xf32, #tpu.memory_space<vmem>>, vector<1x128xf32>
    %11 = vector.broadcast %10 : vector<1x128xf32> to vector<8x128xf32>
    %12 = arith.mulf %11, %8 : vector<8x128xf32>
    %13 = arith.addf %7, %12 : vector<8x128xf32>
    %c2 = arith.constant 2 : index
    %c0_6 = arith.constant 0 : index
    %14 = vector.load %arg2[%c2, %c0_6] : memref<7x128xf32, #tpu.memory_space<vmem>>, vector<1x128xf32>
    %15 = vector.broadcast %14 : vector<1x128xf32> to vector<8x128xf32>
    %16 = arith.mulf %15, %9 : vector<8x128xf32>
    %17 = arith.addf %13, %16 : vector<8x128xf32>
    %c126_i32 = arith.constant 126 : i32
    %18 = tpu.dynamic_rotate %1 by %c126_i32 dim 1 : vector<8x128xf32>, i32 -> vector<8x128xf32>
    %c2_i32 = arith.constant 2 : i32
    %19 = tpu.dynamic_rotate %1 by %c2_i32 dim 1 : vector<8x128xf32>, i32 -> vector<8x128xf32>
    %c5 = arith.constant 5 : index
    %c0_7 = arith.constant 0 : index
    %20 = vector.load %arg2[%c5, %c0_7] : memref<7x128xf32, #tpu.memory_space<vmem>>, vector<1x128xf32>
    %21 = vector.broadcast %20 : vector<1x128xf32> to vector<8x128xf32>
    %22 = arith.mulf %21, %18 : vector<8x128xf32>
    %23 = arith.addf %17, %22 : vector<8x128xf32>
    %c1 = arith.constant 1 : index
    %c0_8 = arith.constant 0 : index
    %24 = vector.load %arg2[%c1, %c0_8] : memref<7x128xf32, #tpu.memory_space<vmem>>, vector<1x128xf32>
    %25 = vector.broadcast %24 : vector<1x128xf32> to vector<8x128xf32>
    %26 = arith.mulf %25, %19 : vector<8x128xf32>
    %27 = arith.addf %23, %26 : vector<8x128xf32>
    %c125_i32 = arith.constant 125 : i32
    %28 = tpu.dynamic_rotate %1 by %c125_i32 dim 1 : vector<8x128xf32>, i32 -> vector<8x128xf32>
    %c3_i32 = arith.constant 3 : i32
    %29 = tpu.dynamic_rotate %1 by %c3_i32 dim 1 : vector<8x128xf32>, i32 -> vector<8x128xf32>
    %c6 = arith.constant 6 : index
    %c0_9 = arith.constant 0 : index
    %30 = vector.load %arg2[%c6, %c0_9] : memref<7x128xf32, #tpu.memory_space<vmem>>, vector<1x128xf32>
    %31 = vector.broadcast %30 : vector<1x128xf32> to vector<8x128xf32>
    %32 = arith.mulf %31, %28 : vector<8x128xf32>
    %33 = arith.addf %27, %32 : vector<8x128xf32>
    %c0_10 = arith.constant 0 : index
    %c0_11 = arith.constant 0 : index
    %34 = vector.load %arg2[%c0_10, %c0_11] : memref<7x128xf32, #tpu.memory_space<vmem>>, vector<1x128xf32>
    %35 = vector.broadcast %34 : vector<1x128xf32> to vector<8x128xf32>
    %36 = arith.mulf %35, %29 : vector<8x128xf32>
    %37 = arith.addf %33, %36 : vector<8x128xf32>
    %38 = tpu.iota {dimensions = array<i32: 1>} : vector<8x128xi32>
    %c15_i32 = arith.constant 15 : i32
    %39 = vector.broadcast %c15_i32 : i32 to vector<8x128xi32>
    %40 = arith.andi %38, %39 : vector<8x128xi32>
    %c1_i32_12 = arith.constant 1 : i32
    %41 = vector.broadcast %c1_i32_12 : i32 to vector<8x128xi32>
    %42 = arith.andi %40, %41 : vector<8x128xi32>
    %c0_i32 = arith.constant 0 : i32
    %43 = vector.broadcast %c0_i32 : i32 to vector<8x128xi32>
    %44 = arith.cmpi eq, %42, %43 : vector<8x128xi32>
    %c2_i32_13 = arith.constant 2 : i32
    %45 = vector.broadcast %c2_i32_13 : i32 to vector<8x128xi32>
    %46 = arith.andi %40, %45 : vector<8x128xi32>
    %c0_i32_14 = arith.constant 0 : i32
    %47 = vector.broadcast %c0_i32_14 : i32 to vector<8x128xi32>
    %48 = arith.cmpi eq, %46, %47 : vector<8x128xi32>
    %c4_i32 = arith.constant 4 : i32
    %49 = vector.broadcast %c4_i32 : i32 to vector<8x128xi32>
    %50 = arith.andi %40, %49 : vector<8x128xi32>
    %c0_i32_15 = arith.constant 0 : i32
    %51 = vector.broadcast %c0_i32_15 : i32 to vector<8x128xi32>
    %52 = arith.cmpi eq, %50, %51 : vector<8x128xi32>
    %c8_i32 = arith.constant 8 : i32
    %53 = vector.broadcast %c8_i32 : i32 to vector<8x128xi32>
    %54 = arith.andi %40, %53 : vector<8x128xi32>
    %c0_i32_16 = arith.constant 0 : i32
    %55 = vector.broadcast %c0_i32_16 : i32 to vector<8x128xi32>
    %56 = arith.cmpi eq, %54, %55 : vector<8x128xi32>
    %c127_i32_17 = arith.constant 127 : i32
    %57 = tpu.dynamic_rotate %37 by %c127_i32_17 dim 1 : vector<8x128xf32>, i32 -> vector<8x128xf32>
    %c1_i32_18 = arith.constant 1 : i32
    %58 = tpu.dynamic_rotate %37 by %c1_i32_18 dim 1 : vector<8x128xf32>, i32 -> vector<8x128xf32>
    %59 = arith.select %44, %57, %58 : vector<8x128xi1>, vector<8x128xf32>
    %60 = arith.maximumf %37, %59 : vector<8x128xf32>
    %c126_i32_19 = arith.constant 126 : i32
    %61 = tpu.dynamic_rotate %60 by %c126_i32_19 dim 1 : vector<8x128xf32>, i32 -> vector<8x128xf32>
    %c2_i32_20 = arith.constant 2 : i32
    %62 = tpu.dynamic_rotate %60 by %c2_i32_20 dim 1 : vector<8x128xf32>, i32 -> vector<8x128xf32>
    %63 = arith.select %48, %61, %62 : vector<8x128xi1>, vector<8x128xf32>
    %64 = arith.maximumf %60, %63 : vector<8x128xf32>
    %c124_i32 = arith.constant 124 : i32
    %65 = tpu.dynamic_rotate %64 by %c124_i32 dim 1 : vector<8x128xf32>, i32 -> vector<8x128xf32>
    %c4_i32_21 = arith.constant 4 : i32
    %66 = tpu.dynamic_rotate %64 by %c4_i32_21 dim 1 : vector<8x128xf32>, i32 -> vector<8x128xf32>
    %67 = arith.select %52, %65, %66 : vector<8x128xi1>, vector<8x128xf32>
    %68 = arith.maximumf %64, %67 : vector<8x128xf32>
    %c120_i32 = arith.constant 120 : i32
    %69 = tpu.dynamic_rotate %68 by %c120_i32 dim 1 : vector<8x128xf32>, i32 -> vector<8x128xf32>
    %c8_i32_22 = arith.constant 8 : i32
    %70 = tpu.dynamic_rotate %68 by %c8_i32_22 dim 1 : vector<8x128xf32>, i32 -> vector<8x128xf32>
    %71 = arith.select %56, %69, %70 : vector<8x128xi1>, vector<8x128xf32>
    %72 = arith.maximumf %68, %71 : vector<8x128xf32>
    %73 = arith.subf %37, %72 : vector<8x128xf32>
    %74 = math.exp %73 : vector<8x128xf32>
    %c127_i32_23 = arith.constant 127 : i32
    %75 = tpu.dynamic_rotate %74 by %c127_i32_23 dim 1 : vector<8x128xf32>, i32 -> vector<8x128xf32>
    %c1_i32_24 = arith.constant 1 : i32
    %76 = tpu.dynamic_rotate %74 by %c1_i32_24 dim 1 : vector<8x128xf32>, i32 -> vector<8x128xf32>
    %77 = arith.select %44, %75, %76 : vector<8x128xi1>, vector<8x128xf32>
    %78 = arith.addf %74, %77 : vector<8x128xf32>
    %c126_i32_25 = arith.constant 126 : i32
    %79 = tpu.dynamic_rotate %78 by %c126_i32_25 dim 1 : vector<8x128xf32>, i32 -> vector<8x128xf32>
    %c2_i32_26 = arith.constant 2 : i32
    %80 = tpu.dynamic_rotate %78 by %c2_i32_26 dim 1 : vector<8x128xf32>, i32 -> vector<8x128xf32>
    %81 = arith.select %48, %79, %80 : vector<8x128xi1>, vector<8x128xf32>
    %82 = arith.addf %78, %81 : vector<8x128xf32>
    %c124_i32_27 = arith.constant 124 : i32
    %83 = tpu.dynamic_rotate %82 by %c124_i32_27 dim 1 : vector<8x128xf32>, i32 -> vector<8x128xf32>
    %c4_i32_28 = arith.constant 4 : i32
    %84 = tpu.dynamic_rotate %82 by %c4_i32_28 dim 1 : vector<8x128xf32>, i32 -> vector<8x128xf32>
    %85 = arith.select %52, %83, %84 : vector<8x128xi1>, vector<8x128xf32>
    %86 = arith.addf %82, %85 : vector<8x128xf32>
    %c120_i32_29 = arith.constant 120 : i32
    %87 = tpu.dynamic_rotate %86 by %c120_i32_29 dim 1 : vector<8x128xf32>, i32 -> vector<8x128xf32>
    %c8_i32_30 = arith.constant 8 : i32
    %88 = tpu.dynamic_rotate %86 by %c8_i32_30 dim 1 : vector<8x128xf32>, i32 -> vector<8x128xf32>
    %89 = arith.select %56, %87, %88 : vector<8x128xi1>, vector<8x128xf32>
    %90 = arith.addf %86, %89 : vector<8x128xf32>
    %91 = tpu.reciprocal %90 {approx = true} : vector<8x128xf32> -> vector<8x128xf32>
    %92 = arith.mulf %90, %91 : vector<8x128xf32>
    %cst = arith.constant 2.000000e+00 : f32
    %93 = vector.broadcast %cst : f32 to vector<8x128xf32>
    %94 = arith.subf %93, %92 : vector<8x128xf32>
    %95 = arith.mulf %91, %94 : vector<8x128xf32>
    %96 = arith.mulf %74, %95 : vector<8x128xf32>
    %c0_31 = arith.constant 0 : index
    %c0_32 = arith.constant 0 : index
    %c0_33 = arith.constant 0 : index
    %97 = vector.load %arg4[%c0_31, %c0_32, %c0_33] : memref<1x8x128xf32, #tpu.memory_space<vmem>>, vector<1x8x128xf32>
    %98 = vector.shape_cast %97 : vector<1x8x128xf32> to vector<8x128xf32>
    %99 = vector.shape_cast %96 : vector<8x128xf32> to vector<1x8x128xf32>
    tpu.vector_store %arg4[%c0_31, %c0_32, %c0_33], %99 {strides = array<i32>} : memref<1x8x128xf32, #tpu.memory_space<vmem>>, vector<1x8x128xf32>,
    return
  }
  func.func @transform_0(%arg0: i32) -> (i32, i32, i32) {
    %c0_i32 = arith.constant 0 : i32
    %c0_i32_0 = arith.constant 0 : i32
    %c0_i32_1 = arith.constant 0 : i32
    return %arg0, %c0_i32, %c0_i32_0 : i32, i32, i32
  }
  func.func @transform_1(%arg0: i32) -> (i32, i32) {
    %c0_i32 = arith.constant 0 : i32
    %c0_i32_0 = arith.constant 0 : i32
    %c0_i32_1 = arith.constant 0 : i32
    return %c0_i32, %c0_i32_0 : i32, i32
  }
  func.func @transform_2(%arg0: i32) -> (i32, i32) {
    %c0_i32 = arith.constant 0 : i32
    %c0_i32_0 = arith.constant 0 : i32
    %c0_i32_1 = arith.constant 0 : i32
    return %c0_i32, %c0_i32_0 : i32, i32
  }
  func.func @transform_3(%arg0: i32) -> (i32, i32, i32) {
    %c0_i32 = arith.constant 0 : i32
    %c0_i32_0 = arith.constant 0 : i32
    %c0_i32_1 = arith.constant 0 : i32
    return %arg0, %c0_i32, %c0_i32_0 : i32, i32, i32
  }
}

</mosaic_0001>

<bundles_post_ra>
// kernel: tpu_custom_call.1
= control target key start
LH: loop header
LB: loop body
LE: loop exit
PB: predicated region body
PF: predicated region fallthrough
CT: control target
= control target key end

     0   :  { %8 = vsyncpa [#allocation3], 0  ;;  %s413_s0 = inlined_call_operand.hbm [shape: f32[1,8,128], index: 0, kind: input, shape index: {}]   ;;  %s414_s1 = inlined_call_operand.hbm [shape: f32[7,128], index: 1, kind: input, shape index: {}]   ;;  %s415_s2 = inlined_call_operand.vmem [shape: f32[1,128], index: 2, kind: input, shape index: {}]   ;;  %s416_s3 = inlined_call_operand.hbm [shape: f32[1,8,128], index: 3, kind: output, shape index: {}]  }
   0x1   :  { %9 = vsyncpa [#allocation6], 0 }
   0x2   :  { %10 = vsyncpa [#allocation4], 0  ;;  %s289_s12 = smov [#allocation2]   ;;  %s290_s14 = smov [#allocation5]  }
   0x3   :  { %s17_s13 = sshll.u32 %s289_s12, 4  ;;  %s27_s15 = sshll.u32 %s290_s14, 4  ;;  %s18_s13 = int_to_ptr.vmem [resolvable:$true] %s17_s13  ;;  %s28_s15 = int_to_ptr.vmem [resolvable:$true] %s27_s15 }
   0x4   :  { %s217_s18 = scalar_lea.hbm %s413_s0, 128 }
   0x5   :  { %p218_p0 = scmp.ne.s32.totalorder %s413_s0, %s217_s18  ;;  %p221_p1 = scmp.lt.u32.totalorder %s217_s18, %s413_s0 }
   0x7   :  { %p223_p2 = pnand %p221_p1, %p218_p0 }
   0x9   :  { %226 = shalt.err (!%p223_p2)
}
   0xa   :  { %s227_s23 = scalar_lea.vmem %s18_s13, 128  ;;  %p232_p4 = scmp.lt.s32.totalorder %s18_s13, %s18_s13 }
   0xb   :  { %p228_p3 = scmp.ne.s32.totalorder %s18_s13, %s227_s23  ;;  %p233_p5 = scmp.lt.s32.totalorder %s227_s23, %s227_s23 }
   0xd   :  { %p234_p6 = por %p233_p5, %p232_p4 }
   0xf   :  { %p235_p7 = pnand %p234_p6, %p228_p3 }
  0x11   :  { %238 = shalt.err (!%p235_p7)
}
  0x12   :  { %20 = dma.hbm_to_vmem [thread:$0]  %s413_s0, 128, %s18_s13, [#allocation3]  }
  0x13   :  { %s239_s28 = scalar_lea.hbm %s414_s1, 128 }
  0x14   :  { %p240_p8 = scmp.ne.s32.totalorder %s414_s1, %s239_s28  ;;  %p243_p9 = scmp.lt.u32.totalorder %s239_s28, %s414_s1 }
  0x16   :  { %p245_p10 = pnand %p243_p9, %p240_p8 }
  0x18   :  { %248 = shalt.err (!%p245_p10)
}
  0x19   :  { %s249_s6 = scalar_lea.vmem %s28_s15, 128  ;;  %p254_p12 = scmp.lt.s32.totalorder %s28_s15, %s28_s15 }
  0x1a   :  { %p250_p11 = scmp.ne.s32.totalorder %s28_s15, %s249_s6  ;;  %p255_p13 = scmp.lt.s32.totalorder %s249_s6, %s249_s6 }
  0x1c   :  { %p256_p0 = por %p255_p13, %p254_p12 }
  0x1e   :  { %p257_p1 = pnand %p256_p0, %p250_p11 }
  0x20   :  { %260 = shalt.err (!%p257_p1)
}
  0x21   :  { %30 = dma.hbm_to_vmem [thread:$0]  %s414_s1, 128, %s28_s15, [#allocation6]  }
  0x22   :  { %283 = dma.done.wait [#allocation3], 128  }
  0x23   :  { %284 = vsyncadd [#allocation3], 4294967168 }
  0x24   :  { %285 = dma.done.wait [#allocation6], 128  }
  0x25   :  { %286 = vsyncadd [#allocation6], 4294967168  ;;  %v39_v0 = vld [vmem:[#allocation2] sm:$0xff]  ;;  %s291_s8 = smov 127   ;;  %s292_s9 = smov 126   ;;  %v108_v29 = vlaneseq }
  0x26   :  { %54 = vrot.lane.b32.xlu0 %v39_v0, %s291_s8  ;;  %72 = vrot.lane.b32.xlu1 %v39_v0, %s292_s9  ;;  %s293_s10 = smov 1   ;;  %s294_s11 = smov 2   ;;  %v192_v1 = vld [vmem:[#allocation5 + $0x3] ss:$0 sm:$0xff]  ;;  %v193_v3 = vld [vmem:[%s415_s2] ss:$0 sm:$0xff] }
  0x27   :  { %s295_s12 = smov 125   ;;  %s296_s1 = smov 3   ;;  %v46_v2 = vmul.f32 %v192_v1, %v39_v0  ;;  %v194_v4 = vld [vmem:[#allocation5 + $0x4] ss:$0 sm:$0xff]  ;;  %v195_v9 = vld [vmem:[#allocation5 + $0x2] ss:$0 sm:$0xff] }
  0x28   :  { %v196_v10 = vld [vmem:[#allocation5 + $0x5] ss:$0 sm:$0xff]  ;;  %v197_v12 = vld [vmem:[#allocation5 + $0x1] ss:$0 sm:$0xff]  ;;  %v198_v16 = vld [vmem:[#allocation5 + $0x6] ss:$0 sm:$0xff] }
  0x29   :  { %v53_v7 = vadd.f32 %v193_v3, %v46_v2  ;;  %v199_v21 = vld [vmem:[#allocation5] ss:$0 sm:$0xff]  ;;  %v109_v30 = vand.u32 127, %v108_v29  ;;  %s297_s2 = smov 4   ;;  %s298_s15 = smov 124  }
  0x2a   :  { %56 = vrot.lane.b32.xlu0 %v39_v0, %s293_s10  ;;  %74 = vrot.lane.b32.xlu1 %v39_v0, %s294_s11  ;;  %s299_s16 = smov 8   ;;  %s300_s17 = smov 120  }
  0x2b   :  { %v110_v31 = vand.u32 15, %v109_v30  ;;  %s301_s18 = smov [#allocation7]  }
  0x2c   :  { %s182_s19 = sshll.u32 %s301_s18, 4  ;;  %s183_s19 = int_to_ptr.vmem [resolvable:$true] %s182_s19 }
  0x2d   :  { %v111_v32 = vand.u32 1, %v110_v31  ;;  %v113_v38 = vand.u32 2, %v110_v31  ;;  %v115_v44 = vand.u32 4, %v110_v31  ;;  %v117_v50 = vand.u32 8, %v110_v31  ;;  %s261_s20 = scalar_lea.vmem %s183_s19, 128  ;;  %p266_p3 = scmp.lt.s32.totalorder %s183_s19, %s183_s19 }
  0x2e   :  { %90 = vrot.lane.b32.xlu0 %v39_v0, %s295_s12  ;;  %92 = vrot.lane.b32.xlu1 %v39_v0, %s296_s1  ;;  %p262_p2 = scmp.ne.s32.totalorder %s183_s19, %s261_s20  ;;  %p267_p4 = scmp.lt.s32.totalorder %s261_s20, %s261_s20 }
  0x2f   :  { %vm355_vm0 = vcmp.eq.s32.totalorder %v111_v32, 0  ;;  %vm363_vm1 = vcmp.eq.s32.totalorder %v113_v38, 0  ;;  %vm371_vm2 = vcmp.eq.s32.totalorder %v115_v44, 0  ;;  %vm379_vm3 = vcmp.eq.s32.totalorder %v117_v50, 0 }
  0x30   :  { %p268_p5 = por %p267_p4, %p266_p3 }
  0x32   :  { %p269_p6 = pnand %p268_p5, %p262_p2 }
  0x98   :  { %v55_v5 = vpop.permute.xlu0 %54  ;;  %v73_v6 = vpop.permute.xlu1 %72 }
  0x99   :  { %v63_v8 = vmul.f32 %v194_v4, %v55_v5  ;;  %v81_v17 = vmul.f32 %v196_v10, %v73_v6 }
  0x9b   :  { %v64_v14 = vadd.f32 %v63_v8, %v53_v7 }
  0x9c   :  { %v57_v11 = vpop.permute.xlu0 %56  ;;  %v75_v13 = vpop.permute.xlu1 %74 }
  0x9d   :  { %v70_v15 = vmul.f32 %v195_v9, %v57_v11  ;;  %v88_v19 = vmul.f32 %v197_v12, %v75_v13 }
  0x9f   :  { %v71_v18 = vadd.f32 %v70_v15, %v64_v14 }
  0xa0   :  { %v91_v20 = vpop.permute.xlu0 %90  ;;  %v93_v22 = vpop.permute.xlu1 %92 }
  0xa1   :  { %v82_v23 = vadd.f32 %v81_v17, %v71_v18  ;;  %v99_v24 = vmul.f32 %v198_v16, %v91_v20  ;;  %v106_v26 = vmul.f32 %v199_v21, %v93_v22 }
  0xa3   :  { %v89_v25 = vadd.f32 %v88_v19, %v82_v23 }
  0xa5   :  { %v100_v27 = vadd.f32 %v99_v24, %v89_v25 }
  0xa7   :  { %v107_v28 = vadd.f32 %v106_v26, %v100_v27 }
  0xa9   :  { %121 = vrot.lane.b32.xlu1 %v107_v28, %s293_s10  ;;  %119 = vrot.lane.b32.xlu0 %v107_v28, %s291_s8 }
 0x11b   :  { %v122_v34 = vpop.permute.xlu1 %121  ;;  %v120_v35 = vpop.permute.xlu0 %119 }
 0x11c   :  { %v123_v36 = vsel %vm355_vm0, %v120_v35, %v122_v34 }
 0x11d   :  { %v124_v37 = vmax.f32 %v107_v28, %v123_v36 }
 0x11f   :  { %127 = vrot.lane.b32.xlu1 %v124_v37, %s294_s11  ;;  %125 = vrot.lane.b32.xlu0 %v124_v37, %s292_s9 }
 0x191   :  { %v128_v40 = vpop.permute.xlu1 %127  ;;  %v126_v41 = vpop.permute.xlu0 %125 }
 0x192   :  { %v129_v42 = vsel %vm363_vm1, %v126_v41, %v128_v40 }
 0x193   :  { %v130_v43 = vmax.f32 %v124_v37, %v129_v42 }
 0x195   :  { %133 = vrot.lane.b32.xlu1 %v130_v43, %s297_s2  ;;  %131 = vrot.lane.b32.xlu0 %v130_v43, %s298_s15 }
 0x207   :  { %v134_v46 = vpop.permute.xlu1 %133  ;;  %v132_v47 = vpop.permute.xlu0 %131 }
 0x208   :  { %v135_v48 = vsel %vm371_vm2, %v132_v47, %v134_v46 }
 0x209   :  { %v136_v49 = vmax.f32 %v130_v43, %v135_v48 }
 0x20b   :  { %139 = vrot.lane.b32.xlu1 %v136_v49, %s299_s16  ;;  %137 = vrot.lane.b32.xlu0 %v136_v49, %s300_s17 }
 0x27d   :  { %v140_v52 = vpop.permute.xlu1 %139  ;;  %v138_v53 = vpop.permute.xlu0 %137 }
 0x27e   :  { %v141_v54 = vsel %vm379_vm3, %v138_v53, %v140_v52 }
 0x27f   :  { %v142_v55 = vmax.f32 %v136_v49, %v141_v54 }
 0x281   :  { %v143_v56 = vsub.f32 %v107_v28, %v142_v55 }
 0x283   :  { %v144_v57 = vmul.f32 1.442695, %v143_v56 }
 0x285   :  { %213 = vpow2.f32 %v144_v57 }
 0x28f   :  { %v214_v58 = vpop.eup %213 }
 0x290   :  { %148 = vrot.lane.b32.xlu1 %v214_v58, %s293_s10  ;;  %146 = vrot.lane.b32.xlu0 %v214_v58, %s291_s8 }
 0x302   :  { %v149_v59 = vpop.permute.xlu1 %148  ;;  %v147_v60 = vpop.permute.xlu0 %146 }
 0x303   :  { %v150_v61 = vsel %vm355_vm0, %v147_v60, %v149_v59 }
 0x304   :  { %v151_v62 = vadd.f32 %v214_v58, %v150_v61 }
 0x306   :  { %154 = vrot.lane.b32.xlu1 %v151_v62, %s294_s11  ;;  %152 = vrot.lane.b32.xlu0 %v151_v62, %s292_s9 }
 0x378   :  { %v155_v63 = vpop.permute.xlu1 %154  ;;  %v153_v0 = vpop.permute.xlu0 %152 }
 0x379   :  { %v156_v1 = vsel %vm363_vm1, %v153_v0, %v155_v63 }
 0x37a   :  { %v157_v2 = vadd.f32 %v156_v1, %v151_v62 }
 0x37c   :  { %160 = vrot.lane.b32.xlu1 %v157_v2, %s297_s2  ;;  %158 = vrot.lane.b32.xlu0 %v157_v2, %s298_s15 }
 0x3ee   :  { %v161_v3 = vpop.permute.xlu1 %160  ;;  %v159_v4 = vpop.permute.xlu0 %158 }
 0x3ef   :  { %v162_v5 = vsel %vm371_vm2, %v159_v4, %v161_v3 }
 0x3f0   :  { %v163_v6 = vadd.f32 %v162_v5, %v157_v2 }
 0x3f2   :  { %166 = vrot.lane.b32.xlu1 %v163_v6, %s299_s16  ;;  %164 = vrot.lane.b32.xlu0 %v163_v6, %s300_s17 }
 0x464   :  { %v167_v7 = vpop.permute.xlu1 %166  ;;  %v165_v8 = vpop.permute.xlu0 %164 }
 0x465   :  { %v168_v9 = vsel %vm379_vm3, %v165_v8, %v167_v7 }
 0x466   :  { %v169_v10 = vadd.f32 %v168_v9, %v163_v6 }
 0x468   :  { %215 = vrcp.f32 %v169_v10 }
 0x472   :  { %v216_v11 = vpop.eup %215 }
 0x473   :  { %v171_v12 = vmul.f32 %v216_v11, %v169_v10 }
 0x475   :  { %v172_v13 = vsub.f32 2.0, %v171_v12 }
 0x477   :  { %v173_v14 = vmul.f32 %v216_v11, %v172_v13 }
 0x479   :  { %v174_v15 = vmul.f32 %v214_v58, %v173_v14 }
 0x47b   :  { %175 = vst [vmem:[#allocation7] sm:$0xff] %v174_v15 }
 0x47c   :  { %272 = shalt.err (!%p269_p6)
}
 0x47d   :  { %s273_s23 = scalar_lea.hbm %s416_s3, 128 }
 0x47e   :  { %p274_p7 = scmp.ne.s32.totalorder %s416_s3, %s273_s23  ;;  %p277_p8 = scmp.lt.u32.totalorder %s273_s23, %s416_s3 }
 0x480   :  { %p279_p9 = pnand %p277_p8, %p274_p7 }
 0x482   :  { %282 = shalt.err (!%p279_p9)
}
 0x483   :  { %185 = dma.vmem_to_hbm [thread:$0]  %s183_s19, 128, %s416_s3, [#allocation4]  }
 0x484   :  { %287 = dma.done.wait [#allocation4], 128  }
 0x485   :  { %288 = vsyncadd [#allocation4], 4294967168 }
 0x486   :  { %189 = vsyncpa [#allocation3], 1 }
 0x487   :  { %190 = vsyncpa [#allocation6], 1 }
 0x488   :  { %191 = vsyncpa [#allocation4], 1 }

// kernel: tpu_custom_call.1
= control target key start
LH: loop header
LB: loop body
LE: loop exit
PB: predicated region body
PF: predicated region fallthrough
CT: control target
= control target key end

     0   :  { %8 = vsyncpa [#allocation3], 0  ;;  %s413_s0 = inlined_call_operand.hbm [shape: f32[1,8,128], index: 0, kind: input, shape index: {}]   ;;  %s414_s1 = inlined_call_operand.hbm [shape: f32[7,128], index: 1, kind: input, shape index: {}]   ;;  %s415_s2 = inlined_call_operand.vmem [shape: f32[1,128], index: 2, kind: input, shape index: {}]   ;;  %s416_s3 = inlined_call_operand.hbm [shape: f32[1,8,128], index: 3, kind: output, shape index: {}]  }
   0x1   :  { %9 = vsyncpa [#allocation6], 0 }
   0x2   :  { %10 = vsyncpa [#allocation4], 0  ;;  %s289_s12 = smov [#allocation2]   ;;  %s290_s14 = smov [#allocation5]  }
   0x3   :  { %s17_s13 = sshll.u32 %s289_s12, 4  ;;  %s27_s15 = sshll.u32 %s290_s14, 4  ;;  %s18_s13 = int_to_ptr.vmem [resolvable:$true] %s17_s13  ;;  %s28_s15 = int_to_ptr.vmem [resolvable:$true] %s27_s15 }
   0x4   :  { %s217_s18 = scalar_lea.hbm %s413_s0, 128 }
   0x5   :  { %p218_p0 = scmp.ne.s32.totalorder %s413_s0, %s217_s18  ;;  %p221_p1 = scmp.lt.u32.totalorder %s217_s18, %s413_s0 }
   0x7   :  { %p223_p2 = pnand %p221_p1, %p218_p0 }
   0x9   :  { %226 = shalt.err (!%p223_p2)
}
   0xa   :  { %s227_s23 = scalar_lea.vmem %s18_s13, 128  ;;  %p232_p4 = scmp.lt.s32.totalorder %s18_s13, %s18_s13 }
   0xb   :  { %p228_p3 = scmp.ne.s32.totalorder %s18_s13, %s227_s23  ;;  %p233_p5 = scmp.lt.s32.totalorder %s227_s23, %s227_s23 }
   0xd   :  { %p234_p6 = por %p233_p5, %p232_p4 }
   0xf   :  { %p235_p7 = pnand %p234_p6, %p228_p3 }
  0x11   :  { %238 = shalt.err (!%p235_p7)
}
  0x12   :  { %20 = dma.hbm_to_vmem [thread:$0]  %s413_s0, 128, %s18_s13, [#allocation3]  }
  0x13   :  { %s239_s28 = scalar_lea.hbm %s414_s1, 128 }
  0x14   :  { %p240_p8 = scmp.ne.s32.totalorder %s414_s1, %s239_s28  ;;  %p243_p9 = scmp.lt.u32.totalorder %s239_s28, %s414_s1 }
  0x16   :  { %p245_p10 = pnand %p243_p9, %p240_p8 }
  0x18   :  { %248 = shalt.err (!%p245_p10)
}
  0x19   :  { %s249_s6 = scalar_lea.vmem %s28_s15, 128  ;;  %p254_p12 = scmp.lt.s32.totalorder %s28_s15, %s28_s15 }
  0x1a   :  { %p250_p11 = scmp.ne.s32.totalorder %s28_s15, %s249_s6  ;;  %p255_p13 = scmp.lt.s32.totalorder %s249_s6, %s249_s6 }
  0x1c   :  { %p256_p0 = por %p255_p13, %p254_p12 }
  0x1e   :  { %p257_p1 = pnand %p256_p0, %p250_p11 }
  0x20   :  { %260 = shalt.err (!%p257_p1)
}
  0x21   :  { %30 = dma.hbm_to_vmem [thread:$0]  %s414_s1, 128, %s28_s15, [#allocation6]  }
  0x22   :  { %283 = dma.done.wait [#allocation3], 128  }
  0x23   :  { %284 = vsyncadd [#allocation3], 4294967168 }
  0x24   :  { %285 = dma.done.wait [#allocation6], 128  }
  0x25   :  { %286 = vsyncadd [#allocation6], 4294967168  ;;  %v39_v0 = vld [vmem:[#allocation2] sm:$0xff]  ;;  %s291_s8 = smov 127   ;;  %s292_s9 = smov 126   ;;  %v108_v29 = vlaneseq }
  0x26   :  { %54 = vrot.lane.b32.xlu0 %v39_v0, %s291_s8  ;;  %72 = vrot.lane.b32.xlu1 %v39_v0, %s292_s9  ;;  %s293_s10 = smov 1   ;;  %s294_s11 = smov 2   ;;  %v192_v1 = vld [vmem:[#allocation5 + $0x3] ss:$0 sm:$0xff]  ;;  %v193_v3 = vld [vmem:[%s415_s2] ss:$0 sm:$0xff] }
  0x27   :  { %s295_s12 = smov 125   ;;  %s296_s1 = smov 3   ;;  %v46_v2 = vmul.f32 %v192_v1, %v39_v0  ;;  %v194_v4 = vld [vmem:[#allocation5 + $0x4] ss:$0 sm:$0xff]  ;;  %v195_v9 = vld [vmem:[#allocation5 + $0x2] ss:$0 sm:$0xff] }
  0x28   :  { %v196_v10 = vld [vmem:[#allocation5 + $0x5] ss:$0 sm:$0xff]  ;;  %v197_v12 = vld [vmem:[#allocation5 + $0x1] ss:$0 sm:$0xff]  ;;  %v198_v16 = vld [vmem:[#allocation5 + $0x6] ss:$0 sm:$0xff] }
  0x29   :  { %v53_v7 = vadd.f32 %v193_v3, %v46_v2  ;;  %v199_v21 = vld [vmem:[#allocation5] ss:$0 sm:$0xff]  ;;  %v109_v30 = vand.u32 127, %v108_v29  ;;  %s297_s2 = smov 4   ;;  %s298_s15 = smov 124  }
  0x2a   :  { %56 = vrot.lane.b32.xlu0 %v39_v0, %s293_s10  ;;  %74 = vrot.lane.b32.xlu1 %v39_v0, %s294_s11  ;;  %s299_s16 = smov 8   ;;  %s300_s17 = smov 120  }
  0x2b   :  { %v110_v31 = vand.u32 15, %v109_v30  ;;  %s301_s18 = smov [#allocation7]  }
  0x2c   :  { %s182_s19 = sshll.u32 %s301_s18, 4  ;;  %s183_s19 = int_to_ptr.vmem [resolvable:$true] %s182_s19 }
  0x2d   :  { %v111_v32 = vand.u32 1, %v110_v31  ;;  %v113_v38 = vand.u32 2, %v110_v31  ;;  %v115_v44 = vand.u32 4, %v110_v31  ;;  %v117_v50 = vand.u32 8, %v110_v31  ;;  %s261_s20 = scalar_lea.vmem %s183_s19, 128  ;;  %p266_p3 = scmp.lt.s32.totalorder %s183_s19, %s183_s19 }
  0x2e   :  { %90 = vrot.lane.b32.xlu0 %v39_v0, %s295_s12  ;;  %92 = vrot.lane.b32.xlu1 %v39_v0, %s296_s1  ;;  %p262_p2 = scmp.ne.s32.totalorder %s183_s19, %s261_s20  ;;  %p267_p4 = scmp.lt.s32.totalorder %s261_s20, %s261_s20 }
  0x2f   :  { %vm355_vm0 = vcmp.eq.s32.totalorder %v111_v32, 0  ;;  %vm363_vm1 = vcmp.eq.s32.totalorder %v113_v38, 0  ;;  %vm371_vm2 = vcmp.eq.s32.totalorder %v115_v44, 0  ;;  %vm379_vm3 = vcmp.eq.s32.totalorder %v117_v50, 0 }
  0x30   :  { %p268_p5 = por %p267_p4, %p266_p3 }
  0x32   :  { %p269_p6 = pnand %p268_p5, %p262_p2 }
  0x98   :  { %v55_v5 = vpop.permute.xlu0 %54  ;;  %v73_v6 = vpop.permute.xlu1 %72 }
  0x99   :  { %v63_v8 = vmul.f32 %v194_v4, %v55_v5  ;;  %v81_v17 = vmul.f32 %v196_v10, %v73_v6 }
  0x9b   :  { %v64_v14 = vadd.f32 %v63_v8, %v53_v7 }
  0x9c   :  { %v57_v11 = vpop.permute.xlu0 %56  ;;  %v75_v13 = vpop.permute.xlu1 %74 }
  0x9d   :  { %v70_v15 = vmul.f32 %v195_v9, %v57_v11  ;;  %v88_v19 = vmul.f32 %v197_v12, %v75_v13 }
  0x9f   :  { %v71_v18 = vadd.f32 %v70_v15, %v64_v14 }
  0xa0   :  { %v91_v20 = vpop.permute.xlu0 %90  ;;  %v93_v22 = vpop.permute.xlu1 %92 }
  0xa1   :  { %v82_v23 = vadd.f32 %v81_v17, %v71_v18  ;;  %v99_v24 = vmul.f32 %v198_v16, %v91_v20  ;;  %v106_v26 = vmul.f32 %v199_v21, %v93_v22 }
  0xa3   :  { %v89_v25 = vadd.f32 %v88_v19, %v82_v23 }
  0xa5   :  { %v100_v27 = vadd.f32 %v99_v24, %v89_v25 }
  0xa7   :  { %v107_v28 = vadd.f32 %v106_v26, %v100_v27 }
  0xa9   :  { %121 = vrot.lane.b32.xlu1 %v107_v28, %s293_s10  ;;  %119 = vrot.lane.b32.xlu0 %v107_v28, %s291_s8 }
 0x11b   :  { %v122_v34 = vpop.permute.xlu1 %121  ;;  %v120_v35 = vpop.permute.xlu0 %119 }
 0x11c   :  { %v123_v36 = vsel %vm355_vm0, %v120_v35, %v122_v34 }
 0x11d   :  { %v124_v37 = vmax.f32 %v107_v28, %v123_v36 }
 0x11f   :  { %127 = vrot.lane.b32.xlu1 %v124_v37, %s294_s11  ;;  %125 = vrot.lane.b32.xlu0 %v124_v37, %s292_s9 }
 0x191   :  { %v128_v40 = vpop.permute.xlu1 %127  ;;  %v126_v41 = vpop.permute.xlu0 %125 }
 0x192   :  { %v129_v42 = vsel %vm363_vm1, %v126_v41, %v128_v40 }
 0x193   :  { %v130_v43 = vmax.f32 %v124_v37, %v129_v42 }
 0x195   :  { %133 = vrot.lane.b32.xlu1 %v130_v43, %s297_s2  ;;  %131 = vrot.lane.b32.xlu0 %v130_v43, %s298_s15 }
 0x207   :  { %v134_v46 = vpop.permute.xlu1 %133  ;;  %v132_v47 = vpop.permute.xlu0 %131 }
 0x208   :  { %v135_v48 = vsel %vm371_vm2, %v132_v47, %v134_v46 }
 0x209   :  { %v136_v49 = vmax.f32 %v130_v43, %v135_v48 }
 0x20b   :  { %139 = vrot.lane.b32.xlu1 %v136_v49, %s299_s16  ;;  %137 = vrot.lane.b32.xlu0 %v136_v49, %s300_s17 }
 0x27d   :  { %v140_v52 = vpop.permute.xlu1 %139  ;;  %v138_v53 = vpop.permute.xlu0 %137 }
 0x27e   :  { %v141_v54 = vsel %vm379_vm3, %v138_v53, %v140_v52 }
 0x27f   :  { %v142_v55 = vmax.f32 %v136_v49, %v141_v54 }
 0x281   :  { %v143_v56 = vsub.f32 %v107_v28, %v142_v55 }
 0x283   :  { %v144_v57 = vmul.f32 1.442695, %v143_v56 }
 0x285   :  { %213 = vpow2.f32 %v144_v57 }
 0x28f   :  { %v214_v58 = vpop.eup %213 }
 0x290   :  { %148 = vrot.lane.b32.xlu1 %v214_v58, %s293_s10  ;;  %146 = vrot.lane.b32.xlu0 %v214_v58, %s291_s8 }
 0x302   :  { %v149_v59 = vpop.permute.xlu1 %148  ;;  %v147_v60 = vpop.permute.xlu0 %146 }
 0x303   :  { %v150_v61 = vsel %vm355_vm0, %v147_v60, %v149_v59 }
 0x304   :  { %v151_v62 = vadd.f32 %v214_v58, %v150_v61 }
 0x306   :  { %154 = vrot.lane.b32.xlu1 %v151_v62, %s294_s11  ;;  %152 = vrot.lane.b32.xlu0 %v151_v62, %s292_s9 }
 0x378   :  { %v155_v63 = vpop.permute.xlu1 %154  ;;  %v153_v0 = vpop.permute.xlu0 %152 }
 0x379   :  { %v156_v1 = vsel %vm363_vm1, %v153_v0, %v155_v63 }
 0x37a   :  { %v157_v2 = vadd.f32 %v156_v1, %v151_v62 }
 0x37c   :  { %160 = vrot.lane.b32.xlu1 %v157_v2, %s297_s2  ;;  %158 = vrot.lane.b32.xlu0 %v157_v2, %s298_s15 }
 0x3ee   :  { %v161_v3 = vpop.permute.xlu1 %160  ;;  %v159_v4 = vpop.permute.xlu0 %158 }
 0x3ef   :  { %v162_v5 = vsel %vm371_vm2, %v159_v4, %v161_v3 }
 0x3f0   :  { %v163_v6 = vadd.f32 %v162_v5, %v157_v2 }
 0x3f2   :  { %166 = vrot.lane.b32.xlu1 %v163_v6, %s299_s16  ;;  %164 = vrot.lane.b32.xlu0 %v163_v6, %s300_s17 }
 0x464   :  { %v167_v7 = vpop.permute.xlu1 %166  ;;  %v165_v8 = vpop.permute.xlu0 %164 }
 0x465   :  { %v168_v9 = vsel %vm379_vm3, %v165_v8, %v167_v7 }
 0x466   :  { %v169_v10 = vadd.f32 %v168_v9, %v163_v6 }
 0x468   :  { %215 = vrcp.f32 %v169_v10 }
 0x472   :  { %v216_v11 = vpop.eup %215 }
 0x473   :  { %v171_v12 = vmul.f32 %v216_v11, %v169_v10 }
 0x475   :  { %v172_v13 = vsub.f32 2.0, %v171_v12 }
 0x477   :  { %v173_v14 = vmul.f32 %v216_v11, %v172_v13 }
 0x479   :  { %v174_v15 = vmul.f32 %v214_v58, %v173_v14 }
 0x47b   :  { %175 = vst [vmem:[#allocation7] sm:$0xff] %v174_v15 }
 0x47c   :  { %272 = shalt.err (!%p269_p6)
}
 0x47d   :  { %s273_s23 = scalar_lea.hbm %s416_s3, 128 }
 0x47e   :  { %p274_p7 = scmp.ne.s32.totalorder %s416_s3, %s273_s23  ;;  %p277_p8 = scmp.lt.u32.totalorder %s273_s23, %s416_s3 }
 0x480   :  { %p279_p9 = pnand %p277_p8, %p274_p7 }
 0x482   :  { %282 = shalt.err (!%p279_p9)
}
 0x483   :  { %185 = dma.vmem_to_hbm [thread:$0]  %s183_s19, 128, %s416_s3, [#allocation4]  }
 0x484   :  { %287 = dma.done.wait [#allocation4], 128  }
 0x485   :  { %288 = vsyncadd [#allocation4], 4294967168 }
 0x486   :  { %189 = vsyncpa [#allocation3], 1 }
 0x487   :  { %190 = vsyncpa [#allocation6], 1 }
 0x488   :  { %191 = vsyncpa [#allocation4], 1 }

</bundles_post_ra>
